<compile_context>
chip_gen: v6e
topology: v6e:2x2x1
jax: 0.10.0
libtpu: 0.0.40
codegen_flags: <defaults>
</compile_context>

<pallas_src>
import numpy as np
import jax
import jax.numpy as jnp
from jax.experimental import pallas as pl
from jax.experimental.pallas import tpu as pltpu


def _round_up(v, m):
    return -(-int(v) // m) * m


def _make_kernel(*, tc, nc, b_pad, w_in, w_out, emit_padded, fuse_affine, dtype, d_pad):
    """Grid axis 0: time chunk (strictly sequential).  Per chunk:
      - DMA a w_in-row window of x (HBM -> VMEM, double-buffered; the NEXT chunk's
        window is prefetched before waiting on this chunk's)
      - for each time step in the chunk: (optionally apply the fused affine module,)
        mask rows >= batch_sizes_t[t] to zero, write the (b_pad, d_pad) tile into the
        time-major padded block (optional) and into the chunk's packed-output window
      - DMA the packed-output window back to HBM (overlaps the next chunk's compute).
        Consecutive windows overlap, so each chunk waits for the previous chunk's
        output DMA (same descriptor it started) before issuing its own.
    Rows >= n_out / lanes >= D of the packed HBM buffer receive scratch junk; the
    wrapper slices them off — never read the raw buffer directly.
    """

    def kernel(rel_in_ref, bs_in_ref, rel_out_ref, win_in_ref, win_out_ref, *refs):
        it = iter(refs)
        x_hbm = next(it)
        if fuse_affine:
            gamma_ref = next(it)
            beta_ref = next(it)
        padded_ref = next(it) if emit_padded else None
        packed_hbm = next(it)
        in_buf = next(it)
        out_buf = next(it)
        in_sem = next(it)
        out_sem = next(it)

        c = pl.program_id(0)
        slot = c & 1

        # ---- hoist every SMEM scalar read above the DMA waits (avoids the .wait()
        # sst->sld forwarding stall; keeps the scalar unit ahead of the VPU) --------
        win_in_cur = win_in_ref[c]
        win_in_nxt = win_in_ref[jnp.minimum(c + 1, nc - 1)]
        win_out_cur = win_out_ref[c]
        win_out_prev = win_out_ref[jnp.maximum(c - 1, 0)]
        b_in = [bs_in_ref[c * tc + tt] for tt in range(tc)]
        r_in = [rel_in_ref[c * tc + tt] for tt in range(tc)]
        r_out = [rel_out_ref[c * tc + tt] for tt in range(tc)]

        def in_copy(start, sl):
            return pltpu.make_async_copy(
                x_hbm.at[pl.ds(start, w_in)],
                in_buf.at[sl, pl.ds(0, w_in)],
                in_sem.at[sl])

        def out_copy(start, sl):
            return pltpu.make_async_copy(
                out_buf.at[sl],
                packed_hbm.at[pl.ds(start, w_out)],
                out_sem.at[sl])

        # Prime the pipeline: chunk 0 fetches its own input window.
        @pl.when(c == 0)
        def _():
            in_copy(win_in_cur, slot).start()

        # Prefetch the NEXT chunk's window BEFORE waiting on this chunk's, so the
        # inbound DMA queue never drains across the wait.
        @pl.when(c + 1 < nc)
        def _():
            in_copy(win_in_nxt, 1 - slot).start()

        in_copy(win_in_cur, slot).wait()

        # Hoisted out of the unrolled step loop (JAX does not CSE broadcasts).
        row_id = jax.lax.broadcasted_iota(jnp.int32, (b_pad, d_pad), 0)
        zero_tile = jnp.zeros((b_pad, d_pad), dtype)
        if fuse_affine:
            g_row = gamma_ref[...]      # (1, d_pad) — broadcasts over rows
            b_row = beta_ref[...]

        # Static (unrolled) loop over the time steps of this chunk.
        for tt in range(tc):
            rows = in_buf[slot, pl.ds(r_in[tt], b_pad), :]
            if fuse_affine:
                rows = rows * g_row + b_row          # fused elementwise module
            tile = jnp.where(row_id < b_in[tt], rows, zero_tile)
            if emit_padded:
                padded_ref[tt] = tile                # time-major padded intermediate
            # re-pack: rows >= bs_out[t] written here are zeros (>= b_in) or are
            # overwritten by the next step / chunk, or land past n_out (sliced off).
            out_buf[slot, pl.ds(r_out[tt], b_pad), :] = tile

        # Consecutive packed-output windows overlap in HBM: wait for the previous
        # chunk's output DMA (which overlapped this chunk's compute) before issuing
        # ours.  The descriptor is rebuilt with the exact same (start, slot).
        @pl.when(c > 0)
        def _():
            out_copy(win_out_prev, 1 - slot).wait()

        out_copy(win_out_cur, slot).start()

        @pl.when(c == nc - 1)
        def _():
            out_copy(win_out_cur, slot).wait()

    return kernel


def var_to_packed(x, batch_sizes_t, batch_seq_len, *, scale=None, shift=None,
                  time_chunk=None, return_padded=False, vmem_budget_bytes=20 << 20):
    """JAX/Pallas equivalent of Var_to_packed.forward (optionally with a fused
    per-feature affine module applied to x first).

    Args:
      x:              f32[N, D], time-major packed data (N = sum(batch_sizes_t)).
      batch_sizes_t:  host int array [T], batch size at each time step (descending).
      batch_seq_len:  host int array [B], per-sequence lengths (descending).
      scale, shift:   optional [D] vectors; if given, x*scale+shift is fused into the
                      kernel (the SequenceWise wrapped-module fast path).
      time_chunk:     time steps per grid iteration; None -> auto-sized so per-chunk
                      windows reach ~512 rows within the VMEM budget.
      return_padded:  also return the time-major [T, B_max, D] intermediate.

    Returns:
      (data, batch_sizes[, padded_tm]) — (data, batch_sizes) mirrors torch's
      PackedSequence (batch_sizes truncated to max(batch_seq_len) like torch).
    """
    batch_sizes_t = np.asarray(batch_sizes_t, np.int64)
    batch_seq_len = np.asarray(batch_seq_len, np.int64)
    T = int(batch_sizes_t.shape[0])
    assert T > 0, "need at least one time step"
    b_max = int(batch_sizes_t[0])
    N, D = x.shape
    assert N > 0 and D > 0
    assert int(batch_sizes_t.sum()) == N, "batch_sizes_t must sum to x.shape[0]"
    max_len = int(batch_seq_len.max()) if batch_seq_len.size else 0
    assert max_len <= T, "batch_seq_len exceeds the padded time dimension"

    bs_out = (batch_seq_len[None, :] > np.arange(T)[:, None]).sum(axis=1).astype(np.int64)
    assert int(bs_out.max()) <= b_max, \
        "batch_seq_len implies more sequences than batch_sizes_t[0]"
    n_out = int(bs_out.sum())

    b_pad = _round_up(b_max, 8)                       # sublane-aligned step tiles
    d_pad = D if D % 128 == 0 else _round_up(D, 128)  # lane-dense feature dim
    itemsize = int(np.dtype(x.dtype).itemsize)
    emit_padded = bool(return_padded)
    fuse_affine = (scale is not None) or (shift is not None)

    # ---- host-side planning: per-step offsets / per-chunk windows (scalar prefetch)
    def plan(tc):
        tc = int(max(1, min(tc, T)))
        nc = -(-T // tc)
        t_pad = nc * tc
        bs_in_p = np.zeros((t_pad,), np.int64); bs_in_p[:T] = batch_sizes_t
        off_in_p = np.zeros((t_pad,), np.int64); off_in_p[1:] = np.cumsum(bs_in_p)[:-1]
        bs_out_p = np.zeros((t_pad,), np.int64); bs_out_p[:T] = bs_out
        off_out_p = np.zeros((t_pad,), np.int64); off_out_p[1:] = np.cumsum(bs_out_p)[:-1]
        chunk_of = np.arange(t_pad) // tc
        first = np.arange(nc) * tc
        last = np.minimum(first + tc, T) - 1
        # input windows: sized from the ACTUAL per-chunk needs, clamped so every
        # window DMA stays inside x (no row padding of x required).
        win_in_ideal = (off_in_p[first] // 8) * 8
        need_in = off_in_p[last] + bs_in_p[last] - win_in_ideal
        w_in = int(min(_round_up(int(need_in.max()), 8), N))
        win_in = np.minimum(win_in_ideal, N - w_in)
        rel_in = off_in_p - win_in[chunk_of]
        rel_in[T:] = 0                                  # tail-padding steps read row 0
        w_in_buf = _round_up(max(int(rel_in.max()) + b_pad, w_in), 8)
        # output windows: starts are EXACT (overwrite chain), uniform size.
        win_out = off_out_p[first]
        rel_out = off_out_p - win_out[chunk_of]
        w_out = _round_up(int(rel_out.max()) + b_pad, 8)
        n_alloc = _round_up(int(win_out[-1]) + w_out, 8)
        vmem = (2 * w_in_buf + 2 * w_out) * d_pad * itemsize
        if emit_padded:
            vmem += 2 * tc * b_pad * d_pad * itemsize   # double-buffered padded block
        if fuse_affine:
            vmem += 4 * d_pad * itemsize
        return dict(tc=tc, nc=nc, t_pad=t_pad, bs_in=bs_in_p, rel_in=rel_in,
                    rel_out=rel_out, win_in=win_in, win_out=win_out,
                    w_in=w_in, w_in_buf=w_in_buf, w_out=w_out,
                    n_alloc=n_alloc, vmem=vmem)

    if time_chunk is None:
        avg_rows = max(1.0, N / float(T))
        tc0 = int(np.clip(round(512.0 / avg_rows), 1, 64))
        p = plan(tc0)
        while p["vmem"] > vmem_budget_bytes and p["tc"] > 1:
            p = plan(max(1, p["tc"] // 2))
    else:
        p = plan(time_chunk)

    # ---- sanity checks on the planned windows (cheap, host-side) ----------------
    for t in range(T):
        c = t // p["tc"]
        assert 0 <= p["win_in"][c] and p["win_in"][c] + p["w_in"] <= N
        assert 0 <= p["rel_in"][t]
        assert p["rel_in"][t] + int(batch_sizes_t[t]) <= p["w_in"]
        assert p["rel_in"][t] + b_pad <= p["w_in_buf"]
        assert 0 <= p["rel_out"][t] and p["rel_out"][t] + b_pad <= p["w_out"]
    for c in range(p["nc"]):
        assert p["win_out"][c] + p["w_out"] <= p["n_alloc"]
    assert p["vmem"] + (2 << 20) <= (56 << 20), \
        "time_chunk too large for the VMEM budget; reduce time_chunk"

    # ---- inputs ------------------------------------------------------------------
    if d_pad == D:
        x_in = x                                   # fast path: zero extra copies of x
    else:
        # TODO(synk): a column-sliced DMA destination would avoid this lane-pad copy.
        x_in = jnp.pad(x, ((0, 0), (0, d_pad - D)))

    inputs = [x_in]
    in_specs = [pl.BlockSpec(memory_space=pl.ANY)]   # x stays in HBM; manual DMA
    if fuse_affine:
        g = jnp.ones((D,), x.dtype) if scale is None else jnp.asarray(scale, x.dtype)
        b = jnp.zeros((D,), x.dtype) if shift is None else jnp.asarray(shift, x.dtype)
        g = g.reshape(1, D)
        b = b.reshape(1, D)
        if d_pad != D:
            g = jnp.pad(g, ((0, 0), (0, d_pad - D)))
            b = jnp.pad(b, ((0, 0), (0, d_pad - D)))
        inputs += [g, b]
        affine_spec = pl.BlockSpec((1, d_pad), lambda c, ri, bi, ro, wi, wo: (0, 0))
        in_specs += [affine_spec, affine_spec]

    out_shape = []
    out_specs = []
    if emit_padded:
        out_shape.append(jax.ShapeDtypeStruct((p["t_pad"], b_pad, d_pad), x.dtype))
        out_specs.append(pl.BlockSpec((p["tc"], b_pad, d_pad),
                                      lambda c, ri, bi, ro, wi, wo: (c, 0, 0)))
    out_shape.append(jax.ShapeDtypeStruct((p["n_alloc"], d_pad), x.dtype))
    out_specs.append(pl.BlockSpec(memory_space=pl.ANY))   # re-packed data, manual DMA

    kernel = _make_kernel(tc=p["tc"], nc=p["nc"], b_pad=b_pad, w_in=p["w_in"],
                          w_out=p["w_out"], emit_padded=emit_padded,
                          fuse_affine=fuse_affine, dtype=x.dtype, d_pad=d_pad)

    grid_spec = pltpu.PrefetchScalarGridSpec(
        num_scalar_prefetch=5,
        grid=(p["nc"],),
        in_specs=in_specs,
        out_specs=out_specs,
        scratch_shapes=[
            pltpu.VMEM((2, p["w_in_buf"], d_pad), x.dtype),   # double-buffered input
            pltpu.VMEM((2, p["w_out"], d_pad), x.dtype),      # double-buffered output
            pltpu.SemaphoreType.DMA((2,)),                    # input-window sems
            pltpu.SemaphoreType.DMA((2,)),                    # output-window sems
        ],
    )

    vmem_limit = int(min(56 << 20, max(32 << 20, 2 * p["vmem"] + (4 << 20))))

    outs = pl.pallas_call(
        kernel,
        grid_spec=grid_spec,
        out_shape=tuple(out_shape),
        compiler_params=pltpu.CompilerParams(
            # The packed-output overwrite chain requires sequential time chunks;
            # this axis must stay "arbitrary" (never "parallel").
            # TODO(synk): on v7x, add a leading "parallel" axis splitting d_pad into
            # per-TensorCore lane slabs.
            dimension_semantics=("arbitrary",),
            vmem_limit_bytes=vmem_limit),
    )(jnp.asarray(p["rel_in"], jnp.int32), jnp.asarray(p["bs_in"], jnp.int32),
      jnp.asarray(p["rel_out"], jnp.int32), jnp.asarray(p["win_in"], jnp.int32),
      jnp.asarray(p["win_out"], jnp.int32), *inputs)

    if emit_padded:
        padded_tm, packed = outs
    else:
        packed = outs[0] if isinstance(outs, (tuple, list)) else outs

    if p["n_alloc"] == n_out and d_pad == D:
        data = packed                                # no wrapper slice pass needed
    else:
        data = packed[:n_out, :D]
    batch_sizes = jnp.asarray(bs_out[:max_len], jnp.int32)

    if emit_padded:
        return data, batch_sizes, padded_tm[:T, :b_max, :D]
    return data, batch_sizes


def sequence_wise(module_fn, packed_data, batch_sizes_t, batch_seq_len, **kw):
    """SequenceWise.forward for an arbitrary wrapped module (applied as plain JAX).

    TODO(synk): arbitrary nn.Modules cannot be fused into the Pallas kernel; use
    sequence_wise_affine for the per-feature affine fast path.
    """
    y = module_fn(packed_data)
    return var_to_packed(y, batch_sizes_t, batch_seq_len, **kw)


def sequence_wise_affine(scale, shift, packed_data, batch_sizes_t, batch_seq_len, **kw):
    """SequenceWise.forward when the wrapped module is a per-feature affine
    (x * scale + shift) — fused into the repack kernel (no extra HBM pass)."""
    return var_to_packed(packed_data, batch_sizes_t, batch_seq_len,
                         scale=scale, shift=shift, **kw)


# --------------------------- pure-numpy reference ----------------------------------
def _np_reference(y, batch_sizes_t, batch_seq_len):
    batch_sizes_t = np.asarray(batch_sizes_t, np.int64)
    batch_seq_len = np.asarray(batch_seq_len, np.int64)
    T = len(batch_sizes_t)
    b_max = int(batch_sizes_t[0])
    D = y.shape[1]
    off = np.zeros((T,), np.int64); off[1:] = np.cumsum(batch_sizes_t)[:-1]
    padded = np.zeros((T, b_max, D), y.dtype)       # time-major, like torch.stack
    for t in range(T):
        bl = int(batch_sizes_t[t])
        padded[t, :bl, :] = y[off[t]:off[t] + bl]
    max_len = int(batch_seq_len.max())
    bs_out = np.array([(batch_seq_len > t).sum() for t in range(max_len)], np.int32)
    data = np.concatenate([padded[t, :int(bs_out[t]), :] for t in range(max_len)],
                          axis=0)
    return padded, data, bs_out


if __name__ == "__main__":
    key = jax.random.PRNGKey(0)
    k_x, k_g, k_b = jax.random.split(key, 3)

    # Small packed-sequence setup: B=4 sequences, max length T=8, features D=128.
    batch_seq_len = np.array([8, 7, 5, 4], np.int64)               # descending lengths
    T = int(batch_seq_len[0])
    batch_sizes_t = np.array([(batch_seq_len > t).sum() for t in range(T)], np.int64)
    N = int(batch_sizes_t.sum())                                    # 24 packed rows
    D = 128                                                         # lane-dense fast path

    x = jax.random.normal(k_x, (N, D), dtype=jnp.float32)           # packed data
    gamma = jax.random.normal(k_g, (D,), dtype=jnp.float32)         # wrapped module:
    beta = jax.random.normal(k_b, (D,), dtype=jnp.float32)          # per-feature affine
    y_np = np.asarray(x) * np.asarray(gamma) + np.asarray(beta)

    # --- Test 1: fused affine module, padded intermediate kept, 3 time chunks -----
    data1, bs1, padded1 = sequence_wise_affine(
        gamma, beta, x, batch_sizes_t, batch_seq_len,
        time_chunk=3, return_padded=True)
    jax.block_until_ready(data1)
    jax.block_until_ready(padded1)
    padded_ref, data_ref, bs_ref = _np_reference(y_np, batch_sizes_t, batch_seq_len)
    assert np.allclose(np.asarray(padded1), padded_ref, atol=1e-5, rtol=1e-5)
    assert np.allclose(np.asarray(data1), data_ref, atol=1e-5, rtol=1e-5)
    assert np.array_equal(np.asarray(bs1), bs_ref)

    # --- Test 2: generic (unfused) module path, shorter batch_seq_len, auto chunk,
    #     packed-only output (padded intermediate skipped) --------------------------
    short_len = np.array([6, 5, 4, 2], np.int64)
    module_fn = lambda d: d * gamma + beta
    data2, bs2 = sequence_wise(module_fn, x, batch_sizes_t, short_len)
    jax.block_until_ready(data2)
    _, data2_ref, bs2_ref = _np_reference(y_np, batch_sizes_t, short_len)
    assert np.allclose(np.asarray(data2), data2_ref, atol=1e-5, rtol=1e-5)
    assert np.array_equal(np.asarray(bs2), bs2_ref)

    # --- Test 3: feature dim not lane-aligned (D=32) -> lane-pad fallback ----------
    D3 = 32
    x3 = x[:, :D3]
    data3, bs3 = sequence_wise_affine(gamma[:D3], beta[:D3], x3, batch_sizes_t,
                                      batch_seq_len, time_chunk=3)
    jax.block_until_ready(data3)
    y3_np = np.asarray(x3) * np.asarray(gamma[:D3]) + np.asarray(beta[:D3])
    _, data3_ref, bs3_ref = _np_reference(y3_np, batch_sizes_t, batch_seq_len)
    assert np.allclose(np.asarray(data3), data3_ref, atol=1e-5, rtol=1e-5)
    assert np.array_equal(np.asarray(bs3), bs3_ref)

    print("KERNEL_OK")
</pallas_src>

<mosaic_0001>
module attributes {stable_mosaic.version = 11 : i64} {
  func.func @kernel(%arg0: i32, %arg1: memref<9xi32, #tpu.memory_space<smem>>, %arg2: memref<9xi32, #tpu.memory_space<smem>>, %arg3: memref<9xi32, #tpu.memory_space<smem>>, %arg4: memref<3xi32, #tpu.memory_space<smem>>, %arg5: memref<3xi32, #tpu.memory_space<smem>>, %arg6: memref<24x128xf32, #tpu.memory_space<any>>, %arg7: memref<1x128xf32, #tpu.memory_space<vmem>>, %arg8: memref<1x128xf32, #tpu.memory_space<vmem>>, %arg9: memref<3x8x128xf32, #tpu.memory_space<vmem>>, %arg10: memref<40x128xf32, #tpu.memory_space<any>>, %arg11: memref<2x24x128xf32, #tpu.memory_space<vmem>>, %arg12: memref<2x16x128xf32, #tpu.memory_space<vmem>>, %arg13: memref<2x!tpu.dma_semaphore, #tpu.memory_space<semaphore_mem>>, %arg14: memref<2x!tpu.dma_semaphore, #tpu.memory_space<semaphore_mem>>) attributes {dimension_semantics = [#tpu.dimension_semantics<arbitrary>], iteration_bounds = array<i64: 3>, scalar_prefetch = 5 : i64, scratch_operands = 4 : i64, tpu.core_type = #tpu.core_type<tc>, window_params = [{}, {pipeline_mode = #tpu.pipeline_mode<synchronous>, transform_indices = @transform_1, window_bounds = array<i64: 1, 128>}, {pipeline_mode = #tpu.pipeline_mode<synchronous>, transform_indices = @transform_2, window_bounds = array<i64: 1, 128>}, {transform_indices = @transform_3, window_bounds = array<i64: 3, 8, 128>}, {}]} {
    %c1_i32 = arith.constant 1 : i32
    %0 = arith.andi %arg0, %c1_i32 : i32
    %1 = arith.index_cast %arg0 : i32 to index
    %2 = memref.load %arg4[%1] : memref<3xi32, #tpu.memory_space<smem>>
    %c1_i32_0 = arith.constant 1 : i32
    %3 = arith.addi %arg0, %c1_i32_0 : i32
    %c2_i32 = arith.constant 2 : i32
    %4 = arith.minsi %3, %c2_i32 : i32
    %5 = arith.index_cast %4 : i32 to index
    %6 = memref.load %arg4[%5] : memref<3xi32, #tpu.memory_space<smem>>
    %7 = arith.index_cast %arg0 : i32 to index
    %8 = memref.load %arg5[%7] : memref<3xi32, #tpu.memory_space<smem>>
    %c1_i32_1 = arith.constant 1 : i32
    %9 = arith.subi %arg0, %c1_i32_1 : i32
    %c0_i32 = arith.constant 0 : i32
    %10 = arith.maxsi %9, %c0_i32 : i32
    %11 = arith.index_cast %10 : i32 to index
    %12 = memref.load %arg5[%11] : memref<3xi32, #tpu.memory_space<smem>>
    %c3_i32 = arith.constant 3 : i32
    %13 = arith.muli %arg0, %c3_i32 : i32
    %c0_i32_2 = arith.constant 0 : i32
    %14 = arith.addi %13, %c0_i32_2 : i32
    %15 = arith.index_cast %14 : i32 to index
    %16 = memref.load %arg2[%15] : memref<9xi32, #tpu.memory_space<smem>>
    %c3_i32_3 = arith.constant 3 : i32
    %17 = arith.muli %arg0, %c3_i32_3 : i32
    %c1_i32_4 = arith.constant 1 : i32
    %18 = arith.addi %17, %c1_i32_4 : i32
    %19 = arith.index_cast %18 : i32 to index
    %20 = memref.load %arg2[%19] : memref<9xi32, #tpu.memory_space<smem>>
    %c3_i32_5 = arith.constant 3 : i32
    %21 = arith.muli %arg0, %c3_i32_5 : i32
    %c2_i32_6 = arith.constant 2 : i32
    %22 = arith.addi %21, %c2_i32_6 : i32
    %23 = arith.index_cast %22 : i32 to index
    %24 = memref.load %arg2[%23] : memref<9xi32, #tpu.memory_space<smem>>
    %c3_i32_7 = arith.constant 3 : i32
    %25 = arith.muli %arg0, %c3_i32_7 : i32
    %c0_i32_8 = arith.constant 0 : i32
    %26 = arith.addi %25, %c0_i32_8 : i32
    %27 = arith.index_cast %26 : i32 to index
    %28 = memref.load %arg1[%27] : memref<9xi32, #tpu.memory_space<smem>>
    %c3_i32_9 = arith.constant 3 : i32
    %29 = arith.muli %arg0, %c3_i32_9 : i32
    %c1_i32_10 = arith.constant 1 : i32
    %30 = arith.addi %29, %c1_i32_10 : i32
    %31 = arith.index_cast %30 : i32 to index
    %32 = memref.load %arg1[%31] : memref<9xi32, #tpu.memory_space<smem>>
    %c3_i32_11 = arith.constant 3 : i32
    %33 = arith.muli %arg0, %c3_i32_11 : i32
    %c2_i32_12 = arith.constant 2 : i32
    %34 = arith.addi %33, %c2_i32_12 : i32
    %35 = arith.index_cast %34 : i32 to index
    %36 = memref.load %arg1[%35] : memref<9xi32, #tpu.memory_space<smem>>
    %c3_i32_13 = arith.constant 3 : i32
    %37 = arith.muli %arg0, %c3_i32_13 : i32
    %c0_i32_14 = arith.constant 0 : i32
    %38 = arith.addi %37, %c0_i32_14 : i32
    %39 = arith.index_cast %38 : i32 to index
    %40 = memref.load %arg3[%39] : memref<9xi32, #tpu.memory_space<smem>>
    %c3_i32_15 = arith.constant 3 : i32
    %41 = arith.muli %arg0, %c3_i32_15 : i32
    %c1_i32_16 = arith.constant 1 : i32
    %42 = arith.addi %41, %c1_i32_16 : i32
    %43 = arith.index_cast %42 : i32 to index
    %44 = memref.load %arg3[%43] : memref<9xi32, #tpu.memory_space<smem>>
    %c3_i32_17 = arith.constant 3 : i32
    %45 = arith.muli %arg0, %c3_i32_17 : i32
    %c2_i32_18 = arith.constant 2 : i32
    %46 = arith.addi %45, %c2_i32_18 : i32
    %47 = arith.index_cast %46 : i32 to index
    %48 = memref.load %arg3[%47] : memref<9xi32, #tpu.memory_space<smem>>
    %c0_i32_19 = arith.constant 0 : i32
    %49 = arith.cmpi eq, %arg0, %c0_i32_19 : i32
    %50 = arith.extui %49 : i1 to i32
    %c0_i32_20 = arith.constant 0 : i32
    %51 = arith.cmpi ne, %50, %c0_i32_20 : i32
    scf.if %51 {
      %c0_i32_50 = arith.constant 0 : i32
      %133 = tpu.memref_slice %arg6[%2, %c0_i32_50] : memref<24x128xf32, #tpu.memory_space<any>> -> memref<16x128xf32, #tpu.memory_space<any>>
      %c0_i32_51 = arith.constant 0 : i32
      %c0_i32_52 = arith.constant 0 : i32
      %134 = tpu.memref_slice %arg11[%0, %c0_i32_51, %c0_i32_52] : memref<2x24x128xf32, #tpu.memory_space<vmem>> -> memref<1x16x128xf32, #tpu.memory_space<vmem>>
      %135 = tpu.memref_squeeze %134 : memref<1x16x128xf32, #tpu.memory_space<vmem>> -> memref<16x128xf32, #tpu.memory_space<vmem>>
      %136 = tpu.memref_slice %arg13[%0] : memref<2x!tpu.dma_semaphore, #tpu.memory_space<semaphore_mem>> -> memref<1x!tpu.dma_semaphore, #tpu.memory_space<semaphore_mem>>
      %137 = tpu.memref_squeeze %136 : memref<1x!tpu.dma_semaphore, #tpu.memory_space<semaphore_mem>> -> memref<!tpu.dma_semaphore, #tpu.memory_space<semaphore_mem>>
      tpu.enqueue_dma source(%133 : memref<16x128xf32, #tpu.memory_space<any>>) target(%135 : memref<16x128xf32, #tpu.memory_space<vmem>>) target_semaphore(%137 : memref<!tpu.dma_semaphore, #tpu.memory_space<semaphore_mem>>)
    } else {
    }
    %c1_i32_21 = arith.constant 1 : i32
    %52 = arith.addi %arg0, %c1_i32_21 : i32
    %c3_i32_22 = arith.constant 3 : i32
    %53 = arith.cmpi slt, %52, %c3_i32_22 : i32
    %54 = arith.extui %53 : i1 to i32
    %c0_i32_23 = arith.constant 0 : i32
    %55 = arith.cmpi ne, %54, %c0_i32_23 : i32
    scf.if %55 {
      %c1_i32_50 = arith.constant 1 : i32
      %133 = arith.subi %c1_i32_50, %0 : i32
      %c0_i32_51 = arith.constant 0 : i32
      %134 = tpu.memref_slice %arg6[%6, %c0_i32_51] : memref<24x128xf32, #tpu.memory_space<any>> -> memref<16x128xf32, #tpu.memory_space<any>>
      %c0_i32_52 = arith.constant 0 : i32
      %c0_i32_53 = arith.constant 0 : i32
      %135 = tpu.memref_slice %arg11[%133, %c0_i32_52, %c0_i32_53] : memref<2x24x128xf32, #tpu.memory_space<vmem>> -> memref<1x16x128xf32, #tpu.memory_space<vmem>>
      %136 = tpu.memref_squeeze %135 : memref<1x16x128xf32, #tpu.memory_space<vmem>> -> memref<16x128xf32, #tpu.memory_space<vmem>>
      %137 = tpu.memref_slice %arg13[%133] : memref<2x!tpu.dma_semaphore, #tpu.memory_space<semaphore_mem>> -> memref<1x!tpu.dma_semaphore, #tpu.memory_space<semaphore_mem>>
      %138 = tpu.memref_squeeze %137 : memref<1x!tpu.dma_semaphore, #tpu.memory_space<semaphore_mem>> -> memref<!tpu.dma_semaphore, #tpu.memory_space<semaphore_mem>>
      tpu.enqueue_dma source(%134 : memref<16x128xf32, #tpu.memory_space<any>>) target(%136 : memref<16x128xf32, #tpu.memory_space<vmem>>) target_semaphore(%138 : memref<!tpu.dma_semaphore, #tpu.memory_space<semaphore_mem>>)
    } else {
    }
    %c0_i32_24 = arith.constant 0 : i32
    %56 = tpu.memref_slice %arg6[%2, %c0_i32_24] : memref<24x128xf32, #tpu.memory_space<any>> -> memref<16x128xf32, #tpu.memory_space<any>>
    %c0_i32_25 = arith.constant 0 : i32
    %c0_i32_26 = arith.constant 0 : i32
    %57 = tpu.memref_slice %arg11[%0, %c0_i32_25, %c0_i32_26] : memref<2x24x128xf32, #tpu.memory_space<vmem>> -> memref<1x16x128xf32, #tpu.memory_space<vmem>>
    %58 = tpu.memref_squeeze %57 : memref<1x16x128xf32, #tpu.memory_space<vmem>> -> memref<16x128xf32, #tpu.memory_space<vmem>>
    %59 = tpu.memref_slice %arg13[%0] : memref<2x!tpu.dma_semaphore, #tpu.memory_space<semaphore_mem>> -> memref<1x!tpu.dma_semaphore, #tpu.memory_space<semaphore_mem>>
    %60 = tpu.memref_squeeze %59 : memref<1x!tpu.dma_semaphore, #tpu.memory_space<semaphore_mem>> -> memref<!tpu.dma_semaphore, #tpu.memory_space<semaphore_mem>>
    tpu.wait_dma2 semaphore(%60 : memref<!tpu.dma_semaphore, #tpu.memory_space<semaphore_mem>>) src(%56 : memref<16x128xf32, #tpu.memory_space<any>>) dst(%58 : memref<16x128xf32, #tpu.memory_space<vmem>>)
    %61 = tpu.iota {dimensions = array<i32: 0>} : vector<8x128xi32>
    %cst = arith.constant 0.000000e+00 : f32
    %62 = vector.broadcast %cst : f32 to vector<8x128xf32>
    %c0 = arith.constant 0 : index
    %c0_27 = arith.constant 0 : index
    %63 = vector.load %arg7[%c0, %c0_27] : memref<1x128xf32, #tpu.memory_space<vmem>>, vector<1x128xf32>
    %c0_28 = arith.constant 0 : index
    %c0_29 = arith.constant 0 : index
    %64 = vector.load %arg8[%c0_28, %c0_29] : memref<1x128xf32, #tpu.memory_space<vmem>>, vector<1x128xf32>
    %65 = arith.index_cast %0 : i32 to index
    %66 = arith.index_cast %28 : i32 to index
    %c0_30 = arith.constant 0 : index
    %67 = vector.load %arg11[%65, %66, %c0_30] : memref<2x24x128xf32, #tpu.memory_space<vmem>>, vector<1x8x128xf32>
    %68 = vector.shape_cast %67 : vector<1x8x128xf32> to vector<8x128xf32>
    %69 = vector.broadcast %63 : vector<1x128xf32> to vector<8x128xf32>
    %70 = arith.mulf %68, %69 : vector<8x128xf32>
    %71 = vector.broadcast %64 : vector<1x128xf32> to vector<8x128xf32>
    %72 = arith.addf %70, %71 : vector<8x128xf32>
    %73 = vector.broadcast %16 : i32 to vector<8x128xi32>
    %74 = arith.cmpi slt, %61, %73 : vector<8x128xi32>
    %75 = arith.select %74, %72, %62 : vector<8x128xi1>, vector<8x128xf32>
    %c0_31 = arith.constant 0 : index
    %c0_32 = arith.constant 0 : index
    %c0_33 = arith.constant 0 : index
    %76 = vector.load %arg9[%c0_31, %c0_32, %c0_33] : memref<3x8x128xf32, #tpu.memory_space<vmem>>, vector<1x8x128xf32>
    %77 = vector.shape_cast %76 : vector<1x8x128xf32> to vector<8x128xf32>
    %78 = vector.shape_cast %75 : vector<8x128xf32> to vector<1x8x128xf32>
    tpu.vector_store %arg9[%c0_31, %c0_32, %c0_33], %78 {strides = array<i32>} : memref<3x8x128xf32, #tpu.memory_space<vmem>>, vector<1x8x128xf32>,
    %79 = arith.index_cast %0 : i32 to index
    %80 = arith.index_cast %40 : i32 to index
    %c0_34 = arith.constant 0 : index
    %81 = vector.load %arg12[%79, %80, %c0_34] : memref<2x16x128xf32, #tpu.memory_space<vmem>>, vector<1x8x128xf32>
    %82 = vector.shape_cast %81 : vector<1x8x128xf32> to vector<8x128xf32>
    %83 = vector.shape_cast %75 : vector<8x128xf32> to vector<1x8x128xf32>
    tpu.vector_store %arg12[%79, %80, %c0_34], %83 {strides = array<i32>} : memref<2x16x128xf32, #tpu.memory_space<vmem>>, vector<1x8x128xf32>,
    %84 = arith.index_cast %0 : i32 to index
    %85 = arith.index_cast %32 : i32 to index
    %c0_35 = arith.constant 0 : index
    %86 = vector.load %arg11[%84, %85, %c0_35] : memref<2x24x128xf32, #tpu.memory_space<vmem>>, vector<1x8x128xf32>
    %87 = vector.shape_cast %86 : vector<1x8x128xf32> to vector<8x128xf32>
    %88 = vector.broadcast %63 : vector<1x128xf32> to vector<8x128xf32>
    %89 = arith.mulf %87, %88 : vector<8x128xf32>
    %90 = vector.broadcast %64 : vector<1x128xf32> to vector<8x128xf32>
    %91 = arith.addf %89, %90 : vector<8x128xf32>
    %92 = vector.broadcast %20 : i32 to vector<8x128xi32>
    %93 = arith.cmpi slt, %61, %92 : vector<8x128xi32>
    %94 = arith.select %93, %91, %62 : vector<8x128xi1>, vector<8x128xf32>
    %c1 = arith.constant 1 : index
    %c0_36 = arith.constant 0 : index
    %c0_37 = arith.constant 0 : index
    %95 = vector.load %arg9[%c1, %c0_36, %c0_37] : memref<3x8x128xf32, #tpu.memory_space<vmem>>, vector<1x8x128xf32>
    %96 = vector.shape_cast %95 : vector<1x8x128xf32> to vector<8x128xf32>
    %97 = vector.shape_cast %94 : vector<8x128xf32> to vector<1x8x128xf32>
    tpu.vector_store %arg9[%c1, %c0_36, %c0_37], %97 {strides = array<i32>} : memref<3x8x128xf32, #tpu.memory_space<vmem>>, vector<1x8x128xf32>,
    %98 = arith.index_cast %0 : i32 to index
    %99 = arith.index_cast %44 : i32 to index
    %c0_38 = arith.constant 0 : index
    %100 = vector.load %arg12[%98, %99, %c0_38] : memref<2x16x128xf32, #tpu.memory_space<vmem>>, vector<1x8x128xf32>
    %101 = vector.shape_cast %100 : vector<1x8x128xf32> to vector<8x128xf32>
    %102 = vector.shape_cast %94 : vector<8x128xf32> to vector<1x8x128xf32>
    tpu.vector_store %arg12[%98, %99, %c0_38], %102 {strides = array<i32>} : memref<2x16x128xf32, #tpu.memory_space<vmem>>, vector<1x8x128xf32>,
    %103 = arith.index_cast %0 : i32 to index
    %104 = arith.index_cast %36 : i32 to index
    %c0_39 = arith.constant 0 : index
    %105 = vector.load %arg11[%103, %104, %c0_39] : memref<2x24x128xf32, #tpu.memory_space<vmem>>, vector<1x8x128xf32>
    %106 = vector.shape_cast %105 : vector<1x8x128xf32> to vector<8x128xf32>
    %107 = vector.broadcast %63 : vector<1x128xf32> to vector<8x128xf32>
    %108 = arith.mulf %106, %107 : vector<8x128xf32>
    %109 = vector.broadcast %64 : vector<1x128xf32> to vector<8x128xf32>
    %110 = arith.addf %108, %109 : vector<8x128xf32>
    %111 = vector.broadcast %24 : i32 to vector<8x128xi32>
    %112 = arith.cmpi slt, %61, %111 : vector<8x128xi32>
    %113 = arith.select %112, %110, %62 : vector<8x128xi1>, vector<8x128xf32>
    %c2 = arith.constant 2 : index
    %c0_40 = arith.constant 0 : index
    %c0_41 = arith.constant 0 : index
    %114 = vector.load %arg9[%c2, %c0_40, %c0_41] : memref<3x8x128xf32, #tpu.memory_space<vmem>>, vector<1x8x128xf32>
    %115 = vector.shape_cast %114 : vector<1x8x128xf32> to vector<8x128xf32>
    %116 = vector.shape_cast %113 : vector<8x128xf32> to vector<1x8x128xf32>
    tpu.vector_store %arg9[%c2, %c0_40, %c0_41], %116 {strides = array<i32>} : memref<3x8x128xf32, #tpu.memory_space<vmem>>, vector<1x8x128xf32>,
    %117 = arith.index_cast %0 : i32 to index
    %118 = arith.index_cast %48 : i32 to index
    %c0_42 = arith.constant 0 : index
    %119 = vector.load %arg12[%117, %118, %c0_42] : memref<2x16x128xf32, #tpu.memory_space<vmem>>, vector<1x8x128xf32>
    %120 = vector.shape_cast %119 : vector<1x8x128xf32> to vector<8x128xf32>
    %121 = vector.shape_cast %113 : vector<8x128xf32> to vector<1x8x128xf32>
    tpu.vector_store %arg12[%117, %118, %c0_42], %121 {strides = array<i32>} : memref<2x16x128xf32, #tpu.memory_space<vmem>>, vector<1x8x128xf32>,
    %c0_i32_43 = arith.constant 0 : i32
    %122 = arith.cmpi sgt, %arg0, %c0_i32_43 : i32
    %123 = arith.extui %122 : i1 to i32
    %c0_i32_44 = arith.constant 0 : i32
    %124 = arith.cmpi ne, %123, %c0_i32_44 : i32
    scf.if %124 {
      %c1_i32_50 = arith.constant 1 : i32
      %133 = arith.subi %c1_i32_50, %0 : i32
      %c0_i32_51 = arith.constant 0 : i32
      %c0_i32_52 = arith.constant 0 : i32
      %134 = tpu.memref_slice %arg12[%133, %c0_i32_51, %c0_i32_52] : memref<2x16x128xf32, #tpu.memory_space<vmem>> -> memref<1x16x128xf32, #tpu.memory_space<vmem>>
      %135 = tpu.memref_squeeze %134 : memref<1x16x128xf32, #tpu.memory_space<vmem>> -> memref<16x128xf32, #tpu.memory_space<vmem>>
      %c0_i32_53 = arith.constant 0 : i32
      %136 = tpu.memref_slice %arg10[%12, %c0_i32_53] : memref<40x128xf32, #tpu.memory_space<any>> -> memref<16x128xf32, #tpu.memory_space<any>>
      %137 = tpu.memref_slice %arg14[%133] : memref<2x!tpu.dma_semaphore, #tpu.memory_space<semaphore_mem>> -> memref<1x!tpu.dma_semaphore, #tpu.memory_space<semaphore_mem>>
      %138 = tpu.memref_squeeze %137 : memref<1x!tpu.dma_semaphore, #tpu.memory_space<semaphore_mem>> -> memref<!tpu.dma_semaphore, #tpu.memory_space<semaphore_mem>>
      tpu.wait_dma2 semaphore(%138 : memref<!tpu.dma_semaphore, #tpu.memory_space<semaphore_mem>>) src(%135 : memref<16x128xf32, #tpu.memory_space<vmem>>) dst(%136 : memref<16x128xf32, #tpu.memory_space<any>>)
    } else {
    }
    %c0_i32_45 = arith.constant 0 : i32
    %c0_i32_46 = arith.constant 0 : i32
    %125 = tpu.memref_slice %arg12[%0, %c0_i32_45, %c0_i32_46] : memref<2x16x128xf32, #tpu.memory_space<vmem>> -> memref<1x16x128xf32, #tpu.memory_space<vmem>>
    %126 = tpu.memref_squeeze %125 : memref<1x16x128xf32, #tpu.memory_space<vmem>> -> memref<16x128xf32, #tpu.memory_space<vmem>>
    %c0_i32_47 = arith.constant 0 : i32
    %127 = tpu.memref_slice %arg10[%8, %c0_i32_47] : memref<40x128xf32, #tpu.memory_space<any>> -> memref<16x128xf32, #tpu.memory_space<any>>
    %128 = tpu.memref_slice %arg14[%0] : memref<2x!tpu.dma_semaphore, #tpu.memory_space<semaphore_mem>> -> memref<1x!tpu.dma_semaphore, #tpu.memory_space<semaphore_mem>>
    %129 = tpu.memref_squeeze %128 : memref<1x!tpu.dma_semaphore, #tpu.memory_space<semaphore_mem>> -> memref<!tpu.dma_semaphore, #tpu.memory_space<semaphore_mem>>
    tpu.enqueue_dma source(%126 : memref<16x128xf32, #tpu.memory_space<vmem>>) target(%127 : memref<16x128xf32, #tpu.memory_space<any>>) target_semaphore(%129 : memref<!tpu.dma_semaphore, #tpu.memory_space<semaphore_mem>>)
    %c2_i32_48 = arith.constant 2 : i32
    %130 = arith.cmpi eq, %arg0, %c2_i32_48 : i32
    %131 = arith.extui %130 : i1 to i32
    %c0_i32_49 = arith.constant 0 : i32
    %132 = arith.cmpi ne, %131, %c0_i32_49 : i32
    scf.if %132 {
      %c0_i32_50 = arith.constant 0 : i32
      %c0_i32_51 = arith.constant 0 : i32
      %133 = tpu.memref_slice %arg12[%0, %c0_i32_50, %c0_i32_51] : memref<2x16x128xf32, #tpu.memory_space<vmem>> -> memref<1x16x128xf32, #tpu.memory_space<vmem>>
      %134 = tpu.memref_squeeze %133 : memref<1x16x128xf32, #tpu.memory_space<vmem>> -> memref<16x128xf32, #tpu.memory_space<vmem>>
      %c0_i32_52 = arith.constant 0 : i32
      %135 = tpu.memref_slice %arg10[%8, %c0_i32_52] : memref<40x128xf32, #tpu.memory_space<any>> -> memref<16x128xf32, #tpu.memory_space<any>>
      %136 = tpu.memref_slice %arg14[%0] : memref<2x!tpu.dma_semaphore, #tpu.memory_space<semaphore_mem>> -> memref<1x!tpu.dma_semaphore, #tpu.memory_space<semaphore_mem>>
      %137 = tpu.memref_squeeze %136 : memref<1x!tpu.dma_semaphore, #tpu.memory_space<semaphore_mem>> -> memref<!tpu.dma_semaphore, #tpu.memory_space<semaphore_mem>>
      tpu.wait_dma2 semaphore(%137 : memref<!tpu.dma_semaphore, #tpu.memory_space<semaphore_mem>>) src(%134 : memref<16x128xf32, #tpu.memory_space<vmem>>) dst(%135 : memref<16x128xf32, #tpu.memory_space<any>>)
    } else {
    }
    return
  }
  func.func @transform_1(%arg0: i32, %arg1: memref<9xi32, #tpu.memory_space<smem>>, %arg2: memref<9xi32, #tpu.memory_space<smem>>, %arg3: memref<9xi32, #tpu.memory_space<smem>>, %arg4: memref<3xi32, #tpu.memory_space<smem>>, %arg5: memref<3xi32, #tpu.memory_space<smem>>) -> (i32, i32) {
    %c0_i32 = arith.constant 0 : i32
    %c0_i32_0 = arith.constant 0 : i32
    %c0_i32_1 = arith.constant 0 : i32
    return %c0_i32, %c0_i32_0 : i32, i32
  }
  func.func @transform_2(%arg0: i32, %arg1: memref<9xi32, #tpu.memory_space<smem>>, %arg2: memref<9xi32, #tpu.memory_space<smem>>, %arg3: memref<9xi32, #tpu.memory_space<smem>>, %arg4: memref<3xi32, #tpu.memory_space<smem>>, %arg5: memref<3xi32, #tpu.memory_space<smem>>) -> (i32, i32) {
    %c0_i32 = arith.constant 0 : i32
    %c0_i32_0 = arith.constant 0 : i32
    %c0_i32_1 = arith.constant 0 : i32
    return %c0_i32, %c0_i32_0 : i32, i32
  }
  func.func @transform_3(%arg0: i32, %arg1: memref<9xi32, #tpu.memory_space<smem>>, %arg2: memref<9xi32, #tpu.memory_space<smem>>, %arg3: memref<9xi32, #tpu.memory_space<smem>>, %arg4: memref<3xi32, #tpu.memory_space<smem>>, %arg5: memref<3xi32, #tpu.memory_space<smem>>) -> (i32, i32, i32) {
    %c0_i32 = arith.constant 0 : i32
    %c0_i32_0 = arith.constant 0 : i32
    %c0_i32_1 = arith.constant 0 : i32
    return %arg0, %c0_i32, %c0_i32_0 : i32, i32, i32
  }
}

</mosaic_0001>

<bundles_post_ra>
// kernel: tpu_custom_call.1
= control target key start
LH: loop header
LB: loop body
LE: loop exit
PB: predicated region body
PF: predicated region fallthrough
CT: control target
= control target key end

     0   :  { %s715_s30 = smov [#allocation7]   ;;  %s1046_s0 = inlined_call_operand.hbm [shape: s32[9], index: 0, kind: input, shape index: {}]   ;;  %s1047_s5 = inlined_call_operand.hbm [shape: f32[24,128], index: 5, kind: input, shape index: {}]   ;;  %s1048_s6 = inlined_call_operand.vmem [shape: f32[1,128], index: 6, kind: input, shape index: {}]   ;;  %s1049_s7 = inlined_call_operand.vmem [shape: f32[1,128], index: 7, kind: input, shape index: {}]   ;;  %s1050_s8 = inlined_call_operand.hbm [shape: f32[9,8,128], index: 8, kind: output, shape index: {0}]   ;;  %s1051_s9 = inlined_call_operand.hbm [shape: f32[40,128], index: 9, kind: output, shape index: {1}]   ;;  %s1052_s1 = inlined_call_operand.vmem [shape: s32[9], index: 1, kind: input, shape index: {}]   ;;  %s1053_s2 = inlined_call_operand.vmem [shape: s32[9], index: 2, kind: input, shape index: {}]   ;;  %s1054_s3 = inlined_call_operand.vmem [shape: s32[3], index: 3, kind: input, shape index: {}]   ;;  %s1055_s4 = inlined_call_operand.vmem [shape: s32[3], index: 4, kind: input, shape index: {}]  }
   0x1   :  { %1071 = sst [smem:[#allocation37_spill]] %s1049_s7  ;;  %s17_s14 = sshll.u32 %s1052_s1, 4  ;;  %s18_s14 = int_to_ptr.vmem [resolvable:$true] %s17_s14 }
   0x2   :  { %1072 = sst [smem:[#allocation38_spill]] %s1050_s8  ;;  %s21_s17 = sshll.u32 %s1053_s2, 4  ;;  %s22_s17 = int_to_ptr.vmem [resolvable:$true] %s21_s17 }
   0x3   :  { %1073 = sst [smem:[#allocation39_spill]] %s1051_s9  ;;  %s519_s18 = scalar_lea.vmem %s18_s14, 16 }
   0x4   :  { %16 = dma.hbm_to_smem %s1046_s0, 16, %s715_s30, [#allocation6] }
   0x5   :  { %p520_p0 = scmp.ne.s32.totalorder %s18_s14, %s519_s18  ;;  %p524_p1 = scmp.lt.s32.totalorder %s18_s14, %s18_s14 }
   0x6   :  { %p525_p2 = scmp.lt.s32.totalorder %s519_s18, %s519_s18 }
   0x8   :  { %p526_p3 = por %p525_p2, %p524_p1 }
   0xa   :  { %p527_p4 = pnand %p526_p3, %p520_p0 }
   0xc   :  { %530 = shalt.err (!%p527_p4)  }
   0xd   :  { %s716_s19 = smov [#allocation8]   ;;  %s25_s21 = sshll.u32 %s1054_s3, 4  ;;  %s26_s21 = int_to_ptr.vmem [resolvable:$true] %s25_s21 }
   0xe   :  { %20 = dma.vmem_to_smem %s18_s14, 16, %s716_s19, [#allocation6] }
   0xf   :  { %s531_s1 = scalar_lea.vmem %s22_s17, 16  ;;  %p536_p6 = scmp.lt.s32.totalorder %s22_s17, %s22_s17 }
  0x10   :  { %p532_p5 = scmp.ne.s32.totalorder %s22_s17, %s531_s1  ;;  %p537_p7 = scmp.lt.s32.totalorder %s531_s1, %s531_s1 }
  0x12   :  { %p538_p8 = por %p537_p7, %p536_p6 }
  0x14   :  { %p539_p9 = pnand %p538_p8, %p532_p5 }
  0x16   :  { %542 = shalt.err (!%p539_p9)  }
  0x17   :  { %s717_s2 = smov [#allocation9]   ;;  %s543_s22 = scalar_lea.vmem %s26_s21, 16 }
  0x18   :  { %24 = dma.vmem_to_smem %s22_s17, 16, %s717_s2, [#allocation6] }
  0x19   :  { %p544_p10 = scmp.ne.s32.totalorder %s26_s21, %s543_s22  ;;  %p548_p11 = scmp.lt.s32.totalorder %s26_s21, %s26_s21 }
  0x1a   :  { %p549_p12 = scmp.lt.s32.totalorder %s543_s22, %s543_s22 }
  0x1c   :  { %p550_p13 = por %p549_p12, %p548_p11 }
  0x1e   :  { %p551_p0 = pnand %p550_p13, %p544_p10 }
  0x20   :  { %554 = shalt.err (!%p551_p0)  }
  0x21   :  { %s718_s23 = smov [#allocation10]   ;;  %s29_s25 = sshll.u32 %s1055_s4, 4  ;;  %s30_s25 = int_to_ptr.vmem [resolvable:$true] %s29_s25 }
  0x22   :  { %28 = dma.vmem_to_smem %s26_s21, 16, %s718_s23, [#allocation6] }
  0x23   :  { %s555_s26 = scalar_lea.vmem %s30_s25, 16  ;;  %p560_p2 = scmp.lt.s32.totalorder %s30_s25, %s30_s25 }
  0x24   :  { %p556_p1 = scmp.ne.s32.totalorder %s30_s25, %s555_s26  ;;  %p561_p3 = scmp.lt.s32.totalorder %s555_s26, %s555_s26 }
  0x26   :  { %p562_p4 = por %p561_p3, %p560_p2 }
  0x28   :  { %p563_p5 = pnand %p562_p4, %p556_p1 }
  0x2a   :  { %566 = shalt.err (!%p563_p5)  }
  0x2b   :  { %s719_s27 = smov [#allocation11]  }
  0x2c   :  { %32 = dma.vmem_to_smem %s30_s25, 16, %s719_s27, [#allocation6] }
  0x2d   :  { %683 = dma.done.wait [#allocation6], 80 }
  0x2e   :  { %684 = vsyncadd [#allocation6], 4294967216 }
  0x2f   :  { %34 = sfence }
  0x30   :  { %35 = vsyncpa [#allocation13], 0 }
  0x31   :  { %37 = vsyncpa [#allocation13 + $0x1], 0  ;;  %s790_s28 = smov 0   ;;  %s792_s29 = smov 0  }
  0x32   :  { %s794_s4 = smov 0   ;;  %s796_s30 = smov 0  }
  0x33 LB: > { %1074 = sst [smem:[#allocation27_spill]] %s701_s28  ;;  %s811_s10 = sadd.s32 4294967295, %s713_s30   ;;  %s713_s30 = sphi %s796_s30, %s1102_s30   ;;  %s709_s4 = sphi %s794_s4, %s1105_s4   ;;  %s705_s29 = sphi %s792_s29, %s1104_s29   ;;  %s701_s28 = sphi %s790_s28, %s1103_s28  }
  0x34   : > { %1075 = sst [smem:[#allocation28_spill]] %s705_s29  ;;  %s429_s11 = sadd.s32 4294967294, %s713_s30  }
  0x35   : > { %1076 = sst [smem:[#allocation29_spill]] %s709_s4  ;;  %s815_s12 = sadd.s32 1, %s713_s30  }
  0x36   : > { %1077 = sst [smem:[#allocation30_spill]] %s713_s30  ;;  %s92_s13 = sadd.s32 1, %s709_s4 }
  0x37   : > { %1078 = sst [smem:[#allocation31_spill]] %s815_s12  ;;  %s89_s14 = ssub.s32 %s713_s30, %s815_s12 }
  0x38   : > { %p102_p6 = scmp.ne.s32.totalorder %s709_s4, %s705_s29  ;;  %p90_p7 = scmp.eq.s32.totalorder %s89_s14, 0 }
  0x39   : > { %p1070_p8 = scmp.eq.s32.totalorder %s811_s10, 2  ;;  %p108_p9 = scmp.ne.s32.totalorder %s705_s29, %s701_s28 }
  0x3a   : > { %p109_p10 = scmp.eq.s32.totalorder %s429_s11, 2  ;;  %p431_p13 = scmp.ge.s32.totalorder %s713_s30, 1 }
  0x3b   : > { %s826_s15 = scalar_select %p90_p7, %s709_s4, %s92_s13  }
  0x3c   : > { %p830_p11 = por %p1070_p8, %p102_p6  ;;  %p834_p12 = por %p109_p10, %p108_p9 }
  0x3d   : > { %1079 = sst [smem:[#allocation32_spill]] %s826_s15  ;;  %p133_p0 = scmp.lt.s32.totalorder %s713_s30, 4 }
  0x3e   : > { %s1080_s16 = scalar_select %p830_p11, 1, 0 }
  0x3f   : > { %s1082_s17 = scalar_select %p834_p12, 1, 0 }
  0x40   : > { %1081 = sst [smem:[#allocation33_spill]] %s1080_s16  ;;  %p134_p1 = pnand %p431_p13, %p133_p0 }
  0x41   : > { %1083 = sst [smem:[#allocation34_spill]] %s1082_s17 }
  0x42   : > { %137 = sbr.rel (%p134_p1) target bundleno = 207 (0xcf), region = 28 }
  0x47   : > { %s1056_s18 = sand.u32 1, %s705_s29   ;;  %s842_s19 = sand.u32 1, %s811_s10 }
  0x48   : > { %s846_s0 = smul.u32 24, %s1056_s18  ;;  %s152_s20 = sld [smem:[#allocation10 + %s811_s10]] }
  0x49   : > { %s850_s21 = sld [smem:[#allocation11 + %s811_s10]]  ;;  %s162_s1 = smul.u32 3, %s811_s10 }
  0x4a   : > { %p467_p2 = scmp.eq.s32.totalorder %s811_s10, 0  ;;  %s872_s15 = smul.u32 24, %s842_s19 }
  0x4b   : > { %s853_s2 = sld [smem:[#allocation8 + %s162_s1]]  ;;  %s164_s22 = sadd.s32 1, %s162_s1 }
  0x4c   : > { %s855_s23 = sld [smem:[#allocation8 + %s164_s22]]  ;;  %s166_s3 = sadd.s32 2, %s162_s1 }
  0x4d   : > { %s857_s24 = sld [smem:[#allocation8 + %s166_s3]]  ;;  %s181_s17 = scalar_lea.vmem [#allocation2], %s872_s15 }
  0x4e   : > { %s860_s25 = sld [smem:[#allocation7 + %s162_s1]]  ;;  %s433_s26 = sshll.u32 %s152_s20, 4 }
  0x4f   : > { %1084 = sst [smem:[#allocation35_spill]] %s850_s21  ;;  %s867_s14 = scalar_lea.hbm %s1047_s5, %s433_s26 }
  0x50   : > { %s862_s27 = sld [smem:[#allocation7 + %s164_s22]]  ;;  %s190_s28 = sshll.u32 %s181_s17, 4  ;;  %s191_s28 = int_to_ptr.vmem [resolvable:$true] %s190_s28 }
  0x51   : > { %s869_s18 = sld [smem:[#allocation7 + %s166_s3]]  ;;  %s882_s11 = sadd.s32 1, %s811_s10 }
  0x52   : > { %s874_s4 = sld [smem:[#allocation9 + %s162_s1]]  ;;  %s885_s26 = scalar_lea.sflag [#allocation4], %s842_s19 }
  0x53   : > { %s876_s12 = sld [smem:[#allocation9 + %s164_s22]]  ;;  %s567_s13 = scalar_lea.hbm %s867_s14, 256 }
  0x54   : > { %s878_s20 = sld [smem:[#allocation9 + %s166_s3]]  ;;  %p568_p3 = scmp.ne.s32.totalorder %s867_s14, %s567_s13 }
  0x55   : > { %s1068_s1 = scalar_lea.hbm %s1047_s5, 384  ;;  %p572_p6 = scmp.lt.s32.totalorder %s867_s14, %s1047_s5 }
  0x56   : > { %p569_p4 = pnand %p568_p3, %p467_p2  ;;  %p573_p7 = scmp.lt.s32.totalorder %s1068_s1, %s567_s13 }
  0x58   : > { %p570_p5 = pneg %p569_p4  ;;  %p574_p9 = por %p573_p7, %p572_p6 }
  0x5a   : > { %1085 = sst [smem:[#allocation36_spill]] %s878_s20  ;;  %p575_p10 = pnand %p574_p9, %p570_p5 }
  0x5c   : > { %578 = shalt.err (!%p575_p10)  }
  0x5d   : > { %s579_s29 = scalar_lea.vmem %s191_s28, 256  ;;  %s720_s8 = smov [#allocation2]  }
  0x5e   : > { %p580_p13 = scmp.ne.s32.totalorder %s191_s28, %s579_s29  ;;  %s583_s30 = sshll.u32 %s720_s8, 4  ;;  %s904_s30 = int_to_ptr.vmem [resolvable:$false] %s583_s30 }
  0x5f   : > { %s1067_s16 = scalar_lea.vmem %s904_s30, 768  ;;  %p586_p3 = scmp.lt.s32.totalorder %s191_s28, %s904_s30 }
  0x60   : > { %p581_p0 = pnand %p580_p13, %p467_p2  ;;  %p587_p4 = scmp.lt.s32.totalorder %s1067_s16, %s579_s29 }
  0x62   : > { %p582_p1 = pneg %p581_p0  ;;  %p588_p6 = por %p587_p4, %p586_p3 }
  0x64   : > { %p589_p5 = pnand %p588_p6, %p582_p1 }
  0x66   : > { %592 = shalt.err (!%p589_p5)  }
  0x67   : > { %454 = dma.hbm_to_vmem [thread:$0]  (%p467_p2), %s867_s14, 256, %s191_s28, %s885_s26 }
  0x68   : > { %p154_p7 = scmp.lt.s32.totalorder %s882_s11, 2  ;;  %s916_s13 = ssub.s32 1, %s842_s19 }
  0x69   : > { %s201_s29 = smul.u32 24, %s916_s13  ;;  %p468_p9 = scmp.lt.s32.totalorder %s882_s11, 3 }
  0x6a   : > { %s155_s22 = scalar_select %p154_p7, %s882_s11, 2 }
  0x6b   : > { %s202_s17 = scalar_lea.vmem [#allocation2], %s201_s29  ;;  %s203_s7 = scalar_lea.sflag [#allocation4], %s916_s13 }
  0x6c   : > { %s156_s3 = sld [smem:[#allocation10 + %s155_s22]]  ;;  %s211_s8 = sshll.u32 %s202_s17, 4  ;;  %s212_s8 = int_to_ptr.vmem [resolvable:$true] %s211_s8 }
  0x6d   : > { %s1086_s17 = scalar_lea.hbm %s1047_s5, 384 }
  0x72   : > { %s435_s16 = sshll.u32 %s156_s3, 4 }
  0x73   : > { %s200_s21 = scalar_lea.hbm %s1047_s5, %s435_s16 }
  0x74   : > { %s593_s20 = scalar_lea.hbm %s200_s21, 256  ;;  %p598_p0 = scmp.lt.s32.totalorder %s200_s21, %s1047_s5 }
  0x75   : > { %p594_p2 = scmp.ne.s32.totalorder %s200_s21, %s593_s20  ;;  %p599_p1 = scmp.lt.s32.totalorder %s1086_s17, %s593_s20 }
  0x77   : > { %p595_p10 = pnand %p594_p2, %p468_p9  ;;  %p600_p3 = por %p599_p1, %p598_p0 }
  0x79   : > { %p596_p13 = pneg %p595_p10 }
  0x7b   : > { %p601_p4 = pnand %p600_p3, %p596_p13 }
  0x7d   : > { %604 = shalt.err (!%p601_p4)  }
  0x7e   : > { %s605_s9 = scalar_lea.vmem %s212_s8, 256  ;;  %p612_p2 = scmp.lt.s32.totalorder %s212_s8, %s904_s30 }
  0x7f   : > { %p606_p6 = scmp.ne.s32.totalorder %s212_s8, %s605_s9  ;;  %s1087_s1 = scalar_lea.vmem %s904_s30, 768 }
  0x80   : > { %p613_p10 = scmp.lt.s32.totalorder %s1087_s1, %s605_s9 }
  0x81   : > { %p607_p5 = pnand %p606_p6, %p468_p9 }
  0x82   : > { %p614_p8 = por %p613_p10, %p612_p2 }
  0x83   : > { %p608_p7 = pneg %p607_p5 }
  0x85   : > { %p615_p12 = pnand %p614_p8, %p608_p7 }
  0x87   : > { %618 = shalt.err (!%p615_p12)  }
  0x88   : > { %456 = dma.hbm_to_vmem [thread:$0]  (%p468_p9), %s200_s21, 256, %s212_s8, %s203_s7 }
  0x89   : > { %s942_s20 = scalar_lea.vmem [#allocation12], %s846_s0 }
  0x8a   : > { %685 = dma.done.wait %s885_s26, 256 }
  0x8b   : > { %686 = vsyncadd %s885_s26, 4294967040  ;;  %s224_s11 = sadd.s32 %s872_s15, %s860_s25  ;;  %v219_v0 = vlaneseq  ;;  %s249_s7 = sadd.s32 %s872_s15, %s862_s27  ;;  %v241_v2 = vstv %s853_s2  ;;  %v254_v3 = vstv %s855_s23  ;;  %v436_v4 = vld [vmem:[%s1048_s6] ss:$0 sm:$0xff] }
  0x8c   : > { %s951_s0 = sshll.u32 %s842_s19, 4  ;;  %p469_p8 = scmp.gt.s32.totalorder %s811_s10, 0  ;;  %v267_v7 = vstv %s857_s24 }
  0x8d   : > { %v220_v1 = vshrl.u32 %v219_v0, 7  ;;  %s262_s21 = sadd.s32 %s872_s15, %s869_s18  ;;  %s1088_s16 = sld [smem:[#allocation36_spill]] }
  0x8e   : > { %s1089_s8 = sld [smem:[#allocation37_spill]]  ;;  %s225_s27 = scalar_lea.vmem [#allocation2], %s224_s11 }
  0x8f   : > { %v226_v6 = vld [vmem:[%s225_s27] sm:$0xff]  ;;  %s246_s28 = sadd.s32 %s951_s0, %s874_s4  ;;  %s250_s14 = scalar_lea.vmem [#allocation2], %s249_s7  ;;  %vm242_vm0 = vcmp.lt.s32.totalorder %v220_v1, %v241_v2  ;;  %vm255_vm1 = vcmp.lt.s32.totalorder %v220_v1, %v254_v3  ;;  %vm268_vm2 = vcmp.lt.s32.totalorder %v220_v1, %v267_v7 }
  0x90   : > { %v233_v8 = vmul.f32 %v436_v4, %v226_v6  ;;  %v251_v9 = vld [vmem:[%s250_s14] sm:$0xff]  ;;  %s259_s2 = sadd.s32 %s951_s0, %s876_s12  ;;  %s263_s15 = scalar_lea.vmem [#allocation2], %s262_s21 }
  0x91   : > { %v264_v10 = vld [vmem:[%s263_s15] sm:$0xff]  ;;  %v252_v11 = vmul.f32 %v436_v4, %v251_v9  ;;  %s247_s4 = scalar_lea.vmem [#allocation3], %s246_s28  ;;  %s260_s12 = scalar_lea.vmem [#allocation3], %s259_s2 }
  0x92   : > { %v265_v12 = vmul.f32 %v436_v4, %v264_v10  ;;  %s280_s24 = scalar_lea.sflag [#allocation5], %s916_s13 }
  0x93   : > { %s272_s18 = sadd.s32 %s951_s0, %s1088_s16 }
  0x94   : > { %v437_v5 = vld [vmem:[%s1089_s8] ss:$0 sm:$0xff]  ;;  %s273_s23 = scalar_lea.vmem [#allocation3], %s272_s18 }
  0x95   : > { %v240_v13 = vadd.f32 %v437_v5, %v233_v8  ;;  %v253_v14 = vadd.f32 %v437_v5, %v252_v11  ;;  %v266_v15 = vadd.f32 %v437_v5, %v265_v12 }
  0x97   : > { %v243_v16 = vsel %vm242_vm0, %v240_v13, 0.0  ;;  %v256_v17 = vsel %vm255_vm1, %v253_v14, 0.0  ;;  %v269_v18 = vsel %vm268_vm2, %v266_v15, 0.0 }
  0x98   : > { %248 = vst [vmem:[%s247_s4] sm:$0xff] %v243_v16  ;;  %244 = vst [vmem:[%s942_s20] sm:$0xff] %v243_v16 }
  0x99   : > { %261 = vst [vmem:[%s260_s12] sm:$0xff] %v256_v17  ;;  %439 = vst [vmem:[%s942_s20 + $0x8] sm:$0xff] %v256_v17 }
  0x9a   : > { %440 = vst [vmem:[%s942_s20 + $0x10] sm:$0xff] %v269_v18  ;;  %274 = vst [vmem:[%s273_s23] sm:$0xff] %v269_v18 }
  0x9b   : > { %688 = dma.done.wait (%p469_p8), %s280_s24, 256 }
  0x9c   : > { %690 = vsyncadd (%p469_p8), %s280_s24, 4294967040  ;;  %s1090_s22 = sld [smem:[#allocation35_spill]]  ;;  %s283_s7 = scalar_lea.vmem [#allocation3], %s951_s0 }
  0x9d   : > { %s1091_s1 = sld [smem:[#allocation39_spill]]  ;;  %s294_s21 = sshll.u32 %s283_s7, 4  ;;  %s295_s21 = int_to_ptr.vmem [resolvable:$true] %s294_s21 }
  0x9e   : > { %s286_s26 = scalar_lea.sflag [#allocation5], %s842_s19  ;;  %s619_s30 = scalar_lea.vmem %s295_s21, 256 }
  0x9f   : > { %p620_p12 = scmp.ne.s32.totalorder %s295_s21, %s619_s30  ;;  %s721_s13 = smov [#allocation3]  }
  0xa0   : > { %s621_s16 = sshll.u32 %s721_s13, 4  ;;  %s622_s16 = int_to_ptr.vmem [resolvable:$false] %s621_s16 }
  0xa1   : > { %s623_s3 = scalar_lea.vmem %s622_s16, 512  ;;  %p624_p9 = scmp.lt.s32.totalorder %s295_s21, %s622_s16 }
  0xa2   : > { %s442_s29 = sshll.u32 %s1090_s22, 4  ;;  %p625_p13 = scmp.lt.s32.totalorder %s623_s3, %s619_s30 }
  0xa3   : > { %s285_s11 = scalar_lea.hbm %s1091_s1, %s442_s29 }
  0xa4   : > { %p626_p0 = por %p625_p13, %p624_p9 }
  0xa6   : > { %p627_p1 = pnand %p626_p0, %p620_p12 }
  0xa8   : > { %630 = shalt.err (!%p627_p1)  }
  0xa9   : > { %s631_s25 = scalar_lea.hbm %s285_s11, 256  ;;  %s633_s0 = scalar_lea.hbm %s1091_s1, 640 }
  0xaa   : > { %p632_p3 = scmp.ne.s32.totalorder %s285_s11, %s631_s25  ;;  %p634_p4 = scmp.lt.s32.totalorder %s285_s11, %s1091_s1 }
  0xab   : > { %p635_p6 = scmp.lt.s32.totalorder %s633_s0, %s631_s25 }
  0xad   : > { %p636_p5 = por %p635_p6, %p634_p4 }
  0xaf   : > { %p637_p7 = pnand %p636_p5, %p632_p3 }
  0xb1   : > { %640 = shalt.err (!%p637_p7)  }
  0xb2   : > { %297 = dma.vmem_to_hbm [thread:$0]  %s295_s21, 256, %s285_s11, %s286_s26 }
  0xb3   : > { %p1092_p2 = scmp.eq.s32.totalorder %s811_s10, 2 }
  0xb5   : > { %692 = dma.done.wait (%p1092_p2), %s286_s26, 256  ;;  %p1093_p10 = pmov %p1092_p2 }
  0xb6   : > { %s1094_s19 = sld [smem:[#allocation28_spill]]  ;;  %s451_s15 = smul.u32 384, %s811_s10 }
  0xb7   : > { %694 = vsyncadd (%p1093_p10), %s286_s26, 4294967040  ;;  %s318_s18 = sshll.u32 %s942_s20, 4  ;;  %s1096_s23 = sld [smem:[#allocation38_spill]]  ;;  %s1002_s18 = int_to_ptr.vmem [resolvable:$true] %s318_s18 }
  0xb8   : > { %s641_s17 = scalar_lea.vmem %s1002_s18, 384  ;;  %s722_s10 = smov [#allocation12]  }
  0xb9   : > { %p642_p8 = scmp.ne.s32.totalorder %s1002_s18, %s641_s17  ;;  %s645_s20 = sshll.u32 %s722_s10, 4  ;;  %s646_s20 = int_to_ptr.vmem [resolvable:$false] %s645_s20 }
  0xba   : > { %s647_s9 = scalar_lea.vmem %s646_s20, 768  ;;  %p648_p13 = scmp.lt.s32.totalorder %s1002_s18, %s646_s20 }
  0xbb   : > { %p643_p12 = pnand %p642_p8, %p830_p11  ;;  %p649_p0 = scmp.lt.s32.totalorder %s647_s9, %s641_s17 }
  0xbc   : > { %s1097_s22 = sand.u32 1, %s1094_s19  }
  0xbd   : > { %s1000_s24 = scalar_lea.hbm %s1096_s23, %s451_s15  ;;  %s1006_s29 = scalar_lea.sflag [#allocation13], %s1097_s22 }
  0xbe   : > { %p644_p9 = pneg %p643_p12  ;;  %p650_p1 = por %p649_p0, %p648_p13 }
  0xc0   : > { %p651_p3 = pnand %p650_p1, %p644_p9 }
  0xc2   : > { %654 = shalt.err (!%p651_p3)
}
  0xc3   : > { %s655_s11 = scalar_lea.hbm %s1000_s24, 384  ;;  %s659_s26 = scalar_lea.hbm %s1096_s23, 1152 }
  0xc4   : > { %p656_p4 = scmp.ne.s32.totalorder %s1000_s24, %s655_s11  ;;  %p660_p7 = scmp.lt.s32.totalorder %s1000_s24, %s1096_s23 }
  0xc5   : > { %p661_p2 = scmp.lt.s32.totalorder %s659_s26, %s655_s11 }
  0xc6   : > { %p657_p6 = pnand %p656_p4, %p830_p11 }
  0xc7   : > { %p662_p10 = por %p661_p2, %p660_p7 }
  0xc8   : > { %p658_p5 = pneg %p657_p6 }
  0xca   : > { %p663_p8 = pnand %p662_p10, %p658_p5 }
  0xcc   : > { %666 = shalt.err (!%p663_p8)
}
  0xcd   : > { %s723_s16 = smov 128   ;;  %s724_s3 = smov 8  }
  0xce   : > { %461 = dma.vmem_to_hbm [thread:$0]  (%p830_p11), %s1002_s18, 384, %s1000_s24, %s1006_s29, %s723_s16, %s723_s16, %s724_s3  }
  0xcf PF: > { %s1098_s25 = sld [smem:[#allocation30_spill]] }
  0xd0   : > { %s1099_s8 = sld [smem:[#allocation27_spill]] }
  0xd1   : > { %s1100_s27 = sld [smem:[#allocation34_spill]] }
  0xd5   : > { %p471_p12 = scmp.ge.s32.totalorder %s1098_s25, 2 }
  0xd6   : > { %s333_s0 = sand.u32 1, %s1099_s8  }
  0xd7   : > { %p1101_p9 = scmp.ne.s32.totalorder %s1100_s27, 0  ;;  %s334_s28 = scalar_lea.sflag [#allocation13], %s333_s0 }
  0xd9   : > { %p464_p13 = pnand %p471_p12, %p1101_p9 }
  0xdb   : > { %p465_p0 = pneg %p464_p13 }
  0xdd   : > { %696 = dma.done.wait (%p465_p0), %s334_s28, 384  }
  0xde   : > { %698 = vsyncadd (%p465_p0), %s334_s28, 4294966912  ;;  %s1102_s30 = sld [smem:[#allocation31_spill]] }
  0xdf   : > { %s1103_s28 = sld [smem:[#allocation28_spill]] }
  0xe0   : > { %s1104_s29 = sld [smem:[#allocation29_spill]] }
  0xe1   : > { %s1105_s4 = sld [smem:[#allocation32_spill]] }
  0xe4   : > { %p40_p1 = scmp.ge.s32.totalorder %s1102_s30, 5  }
  0xe6   :  { %42 = sbr.rel (!%p40_p1) target bundleno = 51 (0x33), region = 109 }
  0xeb   :  { %339 = vsyncpa [#allocation13], 1 }
  0xec   :  { %341 = vsyncpa [#allocation13 + $0x1], 1 }
  0xed   :  { %342 = vsyncmov [#allocation4] }
  0xf0   :  { %s343_s14 = vpop.sfrf %342 }
  0xf1   :  { %p447_p11 = scmp.ne.s32.totalorder %s343_s14, 0 }
  0xf3   :  { %347 = shalt.err (%p447_p11)  }
  0xf4   :  { %349 = vsyncmov [#allocation4 + $0x1] }
  0xf7   :  { %s350_s19 = vpop.sfrf %349 }
  0xf8   :  { %p448_p3 = scmp.ne.s32.totalorder %s350_s19, 0 }
  0xfa   :  { %354 = shalt.err (%p448_p3)  }
  0xfb   :  { %355 = vsyncmov [#allocation5] }
  0xfe   :  { %s356_s2 = vpop.sfrf %355 }
  0xff   :  { %p449_p4 = scmp.ne.s32.totalorder %s356_s2, 0 }
 0x101   :  { %360 = shalt.err (%p449_p4)  }
 0x102   :  { %362 = vsyncmov [#allocation5 + $0x1] }
 0x105   :  { %s363_s15 = vpop.sfrf %362 }
 0x106   :  { %p450_p6 = scmp.ne.s32.totalorder %s363_s15, 0 }
 0x108   :  { %367 = shalt.err (%p450_p6)  }

</bundles_post_ra>
